<compile_context>
chip_gen: v5e
topology: v5e:2x2
jax: 0.10.0
libtpu: 0.0.40
codegen_flags: <defaults>
</compile_context>

<pallas_src>
import functools
import math

import jax
import jax.numpy as jnp
from jax.experimental import pallas as pl
from jax.experimental.pallas import tpu as pltpu

GAMMA = 0.5
LANE = 128
SUBLANES = 8
CHUNK_ROWS = 128        # inner-loop chunk: (128, 128) per operand, ~16 vregs f32
BLOCK_ROWS_MAX = 4096   # (4096, 128) f32 = 2 MiB/buffer; 2 in x 2 bufs = 8 MiB


def _round_up(x, m):
    return ((x + m - 1) // m) * m


def _sublane_align(*dtypes):
    # Sub-32-bit dtypes pack along sublanes; keep row counts aligned to the
    # packed tile height (f32 -> 8, bf16 -> 16, int8/fp8 -> 32).
    align = SUBLANES
    for d in dtypes:
        bits = jnp.dtype(d).itemsize * 8
        align = max(align, SUBLANES * max(1, 32 // bits))
    return align


def _pow_const(v, g):
    # gamma is a trace-time Python constant -> specialize cheap cases.
    if g == 0.5:
        return jnp.sqrt(v)          # single EUP op vs exp(g*log(v))
    if g == 1.0:
        return v
    if g == 2.0:
        return v * v
    return jnp.power(v, jnp.asarray(g, dtype=v.dtype))


def _gce_partial_kernel(x_ref, t_ref, out_ref, *, gamma, chunk_rows, num_chunks,
                        compute_dtype):
    """Accumulates one (8, 128) f32 partial-sum block per grid step.

    The (block_rows, 128) input tile is consumed in (chunk_rows, 128) pieces so
    the live loss temporary never exceeds the vreg file; the running partial is
    a single (8, 128) f32 vreg carried through the fori_loop.
    """
    one = jnp.asarray(1.0, dtype=compute_dtype)

    def chunk_partial(x_raw, t_raw):
        x = x_raw.astype(compute_dtype)
        t = t_raw.astype(compute_dtype)
        px = _pow_const(x, gamma)
        p1mx = _pow_const(one - x, gamma)
        # t*(1-px) + (1-t)*(1-p1mx)  ==  1 - p1mx + t*(p1mx - px)
        loss = (one - p1mx) + t * (p1mx - px)
        loss32 = loss.astype(jnp.float32)
        # Sublane-fold to (8, 128): pure vreg-wise VPU adds.
        return loss32.reshape(chunk_rows // SUBLANES, SUBLANES, LANE).sum(axis=0)

    if num_chunks == 1:
        out_ref[...] = chunk_partial(x_ref[...], t_ref[...])
    else:
        def body(i, acc):
            r0 = pl.multiple_of(i * chunk_rows, chunk_rows)
            return acc + chunk_partial(x_ref[pl.ds(r0, chunk_rows), :],
                                       t_ref[pl.ds(r0, chunk_rows), :])
        out_ref[...] = jax.lax.fori_loop(
            0, num_chunks, body, jnp.zeros((SUBLANES, LANE), jnp.float32))


def generalized_cross_entropy_loss(inp, target, gamma=GAMMA):
    assert gamma > 0.0, "gamma must be > 0"

    # Glue (squeeze / dtype fixes) in plain JAX; keep native dtypes so bf16
    # inputs move only 4 B/elem of HBM traffic.
    x = jnp.squeeze(jnp.asarray(inp))
    t = jnp.asarray(target)
    if not jnp.issubdtype(t.dtype, jnp.floating):
        t = t.astype(jnp.float32)

    if x.shape != t.shape:
        # TODO(synk): mismatched shapes fall back to a materialized broadcast
        # (extra HBM pass); a stride-0 / index-map BlockSpec would avoid it.
        shape = jnp.broadcast_shapes(x.shape, t.shape)
        x = jnp.broadcast_to(x, shape)
        t = jnp.broadcast_to(t, shape)

    n = int(math.prod(x.shape)) if x.shape else 1
    rows = -(-n // LANE)

    align = _sublane_align(x.dtype, t.dtype)
    if rows <= CHUNK_ROWS:
        block_rows = _round_up(max(rows, 1), align)
        chunk_rows = block_rows
        grid_rows = 1
    else:
        # >= 2 grid steps so both v7x TensorCores get work; big blocks to
        # amortize the ~0.35 us per-step overhead on all generations.
        grid_rows = max(2, -(-rows // BLOCK_ROWS_MAX))
        block_rows = _round_up(-(-rows // grid_rows), CHUNK_ROWS)
        chunk_rows = CHUNK_ROWS
    num_chunks = block_rows // chunk_rows
    rows_padded = grid_rows * block_rows

    # Zero-pad up to a whole number of blocks: x=0, t=0 contributes exactly 0
    # loss for any gamma > 0, so no in-kernel validity mask is needed.
    pad = rows_padded * LANE - n
    xf = x.reshape(-1)
    tf = t.reshape(-1)
    if pad:
        xf = jnp.pad(xf, (0, pad))
        tf = jnp.pad(tf, (0, pad))
    xf = xf.reshape(rows_padded, LANE)
    tf = tf.reshape(rows_padded, LANE)

    # bf16 stays bf16 through the elementwise math (packed vregs on v6e/v7x);
    # everything else computes in f32. Accumulation is always f32.
    compute_dtype = (jnp.bfloat16
                     if xf.dtype == jnp.bfloat16 and tf.dtype == jnp.bfloat16
                     else jnp.float32)

    partials = pl.pallas_call(
        functools.partial(_gce_partial_kernel, gamma=gamma,
                          chunk_rows=chunk_rows, num_chunks=num_chunks,
                          compute_dtype=compute_dtype),
        out_shape=jax.ShapeDtypeStruct((grid_rows * SUBLANES, LANE), jnp.float32),
        grid=(grid_rows,),
        in_specs=[
            pl.BlockSpec((block_rows, LANE), lambda i: (i, 0)),
            pl.BlockSpec((block_rows, LANE), lambda i: (i, 0)),
        ],
        out_specs=pl.BlockSpec((SUBLANES, LANE), lambda i: (i, 0)),
        compiler_params=pltpu.CompilerParams(
            dimension_semantics=("parallel",)),  # no carry -> megacore-friendly
    )(xf, tf)

    # Tiny final reduction in plain JAX; 1/gamma and the mean are folded into
    # one scalar divide (hoisted out of the hot loop).
    return jnp.sum(partials) / jnp.float32(n * gamma)


def _reference(inp, target, gamma=GAMMA):
    x = jnp.squeeze(inp).astype(jnp.float32)
    t = jnp.asarray(target, dtype=jnp.float32)
    loss = (1.0 / gamma) * (t * (1.0 - jnp.power(x, gamma))
                            + (1.0 - t) * (1.0 - jnp.power(1.0 - x, gamma)))
    return jnp.mean(loss)


if __name__ == "__main__":
    key = jax.random.PRNGKey(0)
    k_in, k_tg = jax.random.split(key)

    # input: probabilities in (0, 1); target: binary labels, same shape.
    logits = jax.random.normal(k_in, (2, 4, 16, 16), dtype=jnp.float32)
    inp = jax.nn.sigmoid(logits)
    target = jax.random.bernoulli(k_tg, 0.5, (2, 4, 16, 16)).astype(jnp.float32)

    loss = generalized_cross_entropy_loss(inp, target)
    loss = jax.block_until_ready(loss)

    ref = jax.block_until_ready(_reference(inp, target))
    assert jnp.allclose(loss, ref, atol=1e-5, rtol=1e-5), (loss, ref)

    print("KERNEL_OK")
</pallas_src>

<mosaic_0001>
module attributes {stable_mosaic.version = 11 : i64} {
  func.func @_gce_partial_kernel(%arg0: i32, %arg1: memref<16x128xf32, #tpu.memory_space<vmem>>, %arg2: memref<16x128xf32, #tpu.memory_space<vmem>>, %arg3: memref<8x128xf32, #tpu.memory_space<vmem>>) attributes {dimension_semantics = [#tpu.dimension_semantics<parallel>], iteration_bounds = array<i64: 1>, scalar_prefetch = 0 : i64, scratch_operands = 0 : i64, tpu.core_type = #tpu.core_type<tc>, window_params = [{transform_indices = @transform_0, window_bounds = array<i64: 16, 128>}, {transform_indices = @transform_1, window_bounds = array<i64: 16, 128>}, {transform_indices = @transform_2, window_bounds = array<i64: 8, 128>}]} {
    %c0 = arith.constant 0 : index
    %c0_0 = arith.constant 0 : index
    %0 = vector.load %arg1[%c0, %c0_0] : memref<16x128xf32, #tpu.memory_space<vmem>>, vector<16x128xf32>
    %c0_1 = arith.constant 0 : index
    %c0_2 = arith.constant 0 : index
    %1 = vector.load %arg2[%c0_1, %c0_2] : memref<16x128xf32, #tpu.memory_space<vmem>>, vector<16x128xf32>
    %2 = math.sqrt %0 : vector<16x128xf32>
    %cst = arith.constant 1.000000e+00 : f32
    %3 = vector.broadcast %cst : f32 to vector<16x128xf32>
    %4 = arith.subf %3, %0 : vector<16x128xf32>
    %5 = math.sqrt %4 : vector<16x128xf32>
    %cst_3 = arith.constant 1.000000e+00 : f32
    %6 = vector.broadcast %cst_3 : f32 to vector<16x128xf32>
    %7 = arith.subf %6, %5 : vector<16x128xf32>
    %8 = arith.subf %5, %2 : vector<16x128xf32>
    %9 = arith.mulf %1, %8 : vector<16x128xf32>
    %10 = arith.addf %7, %9 : vector<16x128xf32>
    %11 = vector.shape_cast %10 : vector<16x128xf32> to vector<2x8x128xf32>
    %cst_4 = arith.constant dense<0.000000e+00> : vector<8x128xf32>
    %12 = vector.multi_reduction <add>, %11, %cst_4 [0] : vector<2x8x128xf32> to vector<8x128xf32>
    %c0_5 = arith.constant 0 : index
    %c0_6 = arith.constant 0 : index
    %13 = vector.load %arg3[%c0_5, %c0_6] : memref<8x128xf32, #tpu.memory_space<vmem>>, vector<8x128xf32>
    tpu.vector_store %arg3[%c0_5, %c0_6], %12 {strides = array<i32>} : memref<8x128xf32, #tpu.memory_space<vmem>>, vector<8x128xf32>,
    return
  }
  func.func @transform_0(%arg0: i32) -> (i32, i32) {
    %c0_i32 = arith.constant 0 : i32
    %c0_i32_0 = arith.constant 0 : i32
    return %arg0, %c0_i32 : i32, i32
  }
  func.func @transform_1(%arg0: i32) -> (i32, i32) {
    %c0_i32 = arith.constant 0 : i32
    %c0_i32_0 = arith.constant 0 : i32
    return %arg0, %c0_i32 : i32, i32
  }
  func.func @transform_2(%arg0: i32) -> (i32, i32) {
    %c0_i32 = arith.constant 0 : i32
    %c0_i32_0 = arith.constant 0 : i32
    return %arg0, %c0_i32 : i32, i32
  }
}

</mosaic_0001>

<bundles_post_ra>
// kernel: tpu_custom_call.1
= control target key start
LH: loop header
LB: loop body
LE: loop exit
PB: predicated region body
PF: predicated region fallthrough
CT: control target
= control target key end

     0   :  { %7 = vsyncpa [#allocation3], 0  ;;  %s247_s0 = inlined_call_operand.hbm [shape: f32[16,128], index: 0, kind: input, shape index: {}]   ;;  %s248_s1 = inlined_call_operand.hbm [shape: f32[16,128], index: 1, kind: input, shape index: {}]   ;;  %s249_s2 = inlined_call_operand.hbm [shape: f32[8,128], index: 2, kind: output, shape index: {}]  }
   0x1   :  { %8 = vsyncpa [#allocation6], 0 }
   0x2   :  { %9 = vsyncpa [#allocation4], 0  ;;  %s14_s11 = sshll.u32 %s247_s0, 4  ;;  %s217_s12 = smov [#allocation2]   ;;  %s15_s11 = int_to_ptr.hbm [resolvable:$true] %s14_s11 }
   0x3   :  { %s16_s13 = sshll.u32 %s217_s12, 4  ;;  %s27_s16 = sshll.u32 %s248_s1, 4  ;;  %s17_s13 = int_to_ptr.vmem [resolvable:$true] %s16_s13  ;;  %s28_s16 = int_to_ptr.hbm [resolvable:$true] %s27_s16 }
   0x4   :  { %s218_s17 = smov 128   ;;  %s219_s18 = smov 8  }
   0x5   :  { %22 = dma.hbm_to_vmem [thread:$0]  %s15_s11, 256, %s17_s13, [#allocation3], %s218_s17, %s218_s17, %s219_s18  }
   0x6   :  { %s220_s19 = smov [#allocation5]  }
   0x7   :  { %s29_s20 = sshll.u32 %s220_s19, 4  ;;  %s30_s20 = int_to_ptr.vmem [resolvable:$true] %s29_s20 }
   0x8   :  { %35 = dma.hbm_to_vmem [thread:$0]  %s28_s16, 256, %s30_s20, [#allocation6], %s218_s17, %s218_s17, %s219_s18  }
   0x9   :  { %211 = dma.done.wait [#allocation3], 256  }
   0xa   :  { %212 = vsyncadd [#allocation3], 4294967040 }
   0xb   :  { %213 = dma.done.wait [#allocation6], 256  }
   0xc   :  { %214 = vsyncadd [#allocation6], 4294967040  ;;  %v44_v0 = vld [vmem:[#allocation2] sm:$0xff]  ;;  %v45_v1 = vld [vmem:[#allocation2 + $0x8] sm:$0xff]  ;;  %s221_s0 = smov [#allocation7]   ;;  %s115_s23 = sshll.u32 %s249_s2, 4  ;;  %s116_s23 = int_to_ptr.hbm [resolvable:$true] %s115_s23 }
   0xd   :  { %131 = vrsqrt.f32 %v44_v0  ;;  %v72_v2 = vsub.f32 1.0, %v44_v0  ;;  %v73_v3 = vsub.f32 1.0, %v45_v1  ;;  %vm55_vm0 = vcmp.eq.f32.partialorder %v44_v0, inf  ;;  %v46_v41 = vld [vmem:[#allocation5] sm:$0xff]  ;;  %v47_v44 = vld [vmem:[#allocation5 + $0x8] sm:$0xff]  ;;  %s113_s1 = sshll.u32 %s221_s0, 4  ;;  %s114_s1 = int_to_ptr.vmem [resolvable:$true] %s113_s1 }
   0xe   :  { %133 = vrsqrt.f32 %v45_v1  ;;  %vm67_vm1 = vcmp.eq.f32.partialorder %v45_v1, inf  ;;  %vm57_vm2 = vcmp.eq.f32.partialorder %v44_v0, 0.0  ;;  %v58_v26 = vand.u32 2147483648, %v44_v0 }
   0xf   :  { %135 = vrsqrt.f32 %v72_v2  ;;  %vm69_vm3 = vcmp.eq.f32.partialorder %v45_v1, 0.0  ;;  %v70_v30 = vand.u32 2147483648, %v45_v1  ;;  %vm81_vm4 = vcmp.eq.f32.partialorder %v72_v2, inf }
  0x10   :  { %137 = vrsqrt.f32 %v73_v3  ;;  %v84_v33 = vand.u32 2147483648, %v72_v2  ;;  %vm83_vm5 = vcmp.eq.f32.partialorder %v72_v2, 0.0  ;;  %vm93_vm6 = vcmp.eq.f32.partialorder %v73_v3, inf }
  0x11   :  { %v96_v36 = vand.u32 2147483648, %v73_v3  ;;  %vm95_vm7 = vcmp.eq.f32.partialorder %v73_v3, 0.0 }
  0x13   :  { %v132_v4 = vpop.eup %131 }
  0x14   :  { %v134_v5 = vpop.eup %133  ;;  %v49_v6 = vmul.f32 %v132_v4, %v44_v0 }
  0x15   :  { %v61_v7 = vmul.f32 %v134_v5, %v45_v1  ;;  %v136_v9 = vpop.eup %135 }
  0x16   :  { %v50_v8 = vmul.f32 %v132_v4, %v49_v6  ;;  %v138_v11 = vpop.eup %137  ;;  %v75_v13 = vmul.f32 %v136_v9, %v72_v2 }
  0x17   :  { %v62_v10 = vmul.f32 %v134_v5, %v61_v7  ;;  %v87_v15 = vmul.f32 %v138_v11, %v73_v3 }
  0x18   :  { %v51_v12 = vmul.f32 0.5, %v50_v8  ;;  %v76_v17 = vmul.f32 %v136_v9, %v75_v13 }
  0x19   :  { %v63_v14 = vmul.f32 0.5, %v62_v10  ;;  %v88_v19 = vmul.f32 %v138_v11, %v87_v15 }
  0x1a   :  { %v52_v16 = vsub.f32 1.5, %v51_v12  ;;  %v77_v21 = vmul.f32 0.5, %v76_v17 }
  0x1b   :  { %v64_v18 = vsub.f32 1.5, %v63_v14  ;;  %v89_v23 = vmul.f32 0.5, %v88_v19 }
  0x1c   :  { %v53_v20 = vmul.f32 %v132_v4, %v52_v16  ;;  %v78_v25 = vsub.f32 1.5, %v77_v21 }
  0x1d   :  { %v65_v22 = vmul.f32 %v134_v5, %v64_v18  ;;  %v90_v28 = vsub.f32 1.5, %v89_v23 }
  0x1e   :  { %v54_v24 = vmul.f32 %v53_v20, %v44_v0  ;;  %v79_v31 = vmul.f32 %v136_v9, %v78_v25 }
  0x1f   :  { %v66_v27 = vmul.f32 %v65_v22, %v45_v1  ;;  %v91_v34 = vmul.f32 %v138_v11, %v90_v28 }
  0x20   :  { %v56_v29 = vsel %vm55_vm0, %v44_v0, %v54_v24  ;;  %v80_v35 = vmul.f32 %v79_v31, %v72_v2 }
  0x21   :  { %v68_v32 = vsel %vm67_vm1, %v45_v1, %v66_v27  ;;  %v59_v37 = vsel %vm57_vm2, %v58_v26, %v56_v29  ;;  %v92_v38 = vmul.f32 %v91_v34, %v73_v3 }
  0x22   :  { %v71_v39 = vsel %vm69_vm3, %v70_v30, %v68_v32  ;;  %v82_v40 = vsel %vm81_vm4, %v72_v2, %v80_v35 }
  0x23   :  { %v85_v42 = vsel %vm83_vm5, %v84_v33, %v82_v40  ;;  %v94_v43 = vsel %vm93_vm6, %v73_v3, %v92_v38 }
  0x24   :  { %v97_v45 = vsel %vm95_vm7, %v96_v36, %v94_v43  ;;  %v98_v46 = vsub.f32 1.0, %v85_v42  ;;  %v100_v47 = vsub.f32 %v85_v42, %v59_v37 }
  0x25   :  { %v99_v48 = vsub.f32 1.0, %v97_v45  ;;  %v101_v49 = vsub.f32 %v97_v45, %v71_v39 }
  0x26   :  { %v102_v50 = vmul.f32 %v100_v47, %v46_v41 }
  0x27   :  { %v103_v51 = vmul.f32 %v101_v49, %v47_v44 }
  0x28   :  { %v104_v52 = vadd.f32 %v102_v50, %v98_v46 }
  0x29   :  { %v105_v53 = vadd.f32 %v103_v51, %v99_v48 }
  0x2b   :  { %v106_v54 = vadd.f32 %v105_v53, %v104_v52 }
  0x2d   :  { %107 = vst [vmem:[#allocation7] sm:$0xff] %v106_v54 }
  0x2e   :  { %118 = dma.vmem_to_hbm [thread:$0]  %s114_s1, 128, %s116_s23, [#allocation4]  }
  0x2f   :  { %215 = dma.done.wait [#allocation4], 128  }
  0x30   :  { %216 = vsyncadd [#allocation4], 4294967168 }
  0x31   :  { %123 = vsyncpa [#allocation3], 1 }
  0x32   :  { %124 = vsyncpa [#allocation6], 1 }
  0x33   :  { %125 = vsyncpa [#allocation4], 1 }

</bundles_post_ra>
